<compile_context>
chip_gen: v7x
topology: tpu7x:2x2x1
jax: 0.10.0
libtpu: 0.0.40
codegen_flags: <defaults>
</compile_context>

<pallas_src>
import jax
import jax.numpy as jnp
from jax.experimental import pallas as pl
from jax.experimental.pallas import tpu as pltpu


_LANE = 128
_SUBLANE = 8


def image_model_kernel(x_ref, w1t_ref, b1_ref, w2t_ref, b2_ref, w3t_ref, b3_ref,
                       o_ref):
    # x_ref: (Bt, H*W, C) -- channels on lanes. Pool over the spatial axis in
    # f32 (VPU adds across sublane-blocks of HW + one cheap sublane reduce).
    # The 1/(H*W) mean scale is pre-folded into w1t, so a plain sum suffices.
    feat = jnp.sum(x_ref[...].astype(jnp.float32), axis=1)            # (Bt, C)

    # linear1 + relu   (F.linear: x @ W.T + b; W.T passed in, mean folded in)
    h = jnp.dot(feat, w1t_ref[...], preferred_element_type=jnp.float32) + b1_ref[...]
    h = jnp.maximum(h, 0.0)
    # linear2 + relu
    h = jnp.dot(h, w2t_ref[...], preferred_element_type=jnp.float32) + b2_ref[...]
    h = jnp.maximum(h, 0.0)
    # linear3 (no activation); w3t/b3 are zero-padded to a 128-lane block.
    out = jnp.dot(h, w3t_ref[...], preferred_element_type=jnp.float32) + b3_ref[...]
    o_ref[...] = out.astype(o_ref.dtype)


def prepare_params(params, hw):
    """One-time weight prep: transpose, fold mean scale, pad output lanes."""
    w1, b1 = params["w1"], params["b1"]   # (32, C), (32,)
    w2, b2 = params["w2"], params["b2"]   # (16, 32), (16,)
    w3, b3 = params["w3"], params["b3"]   # (out, 16), (out,)
    out_size = int(w3.shape[0])
    out_pad = max(_LANE, ((out_size + _LANE - 1) // _LANE) * _LANE)

    w1t = (w1.T * (1.0 / float(hw))).astype(jnp.float32)    # (C, 32), mean folded
    w2t = w2.T.astype(jnp.float32)                           # (32, 16)
    w3t = jnp.zeros((w3.shape[1], out_pad), jnp.float32).at[:, :out_size].set(
        w3.T.astype(jnp.float32))                            # (16, out_pad)
    b3p = jnp.zeros((1, out_pad), jnp.float32).at[:, :out_size].set(
        b3.astype(jnp.float32))

    return {
        "w1t": w1t, "b1": b1.reshape(1, -1).astype(jnp.float32),
        "w2t": w2t, "b2": b2.reshape(1, -1).astype(jnp.float32),
        "w3t": w3t, "b3": b3p,
        "out_size": out_size,
    }


def _round_up(x, m):
    return ((x + m - 1) // m) * m


def _vmem_budgets():
    """Generation-aware VMEM limits (v7x 64 MiB/TC vs v5e/v6e 128 MiB)."""
    vmem_bytes = 64 * 1024 * 1024   # conservative fallback = v7x per-TC VMEM
    try:
        info = pltpu.get_tpu_info()
        vmem_bytes = int(getattr(info, "vmem_capacity_bytes", vmem_bytes))
    except Exception:
        pass
    # Leave headroom for resident weights, double-buffered output & scratch.
    limit = min((vmem_bytes * 3) // 4, 100 * 1024 * 1024)
    input_budget = (limit * 3) // 5
    return input_budget, limit


def _pick_batch_tile(B, padded_row_bytes, input_budget):
    """Batch tile: fits the (padding-aware) VMEM budget double-buffered, is a
    multiple of 8 (or the full batch when B < 8), and keeps >= ~4 grid steps
    when possible so DMA pipelining / v7x 2-TC sharding has work to overlap."""
    if B <= _SUBLANE:
        return B                                    # full-dim block (toy sizes)
    cap = max(_SUBLANE, (input_budget // (2 * padded_row_bytes)))
    cap = max(_SUBLANE, (cap // _SUBLANE) * _SUBLANE)
    target = _round_up(pl.cdiv(B, 4), _SUBLANE)     # aim for >= 4 grid steps
    bt = min(cap, target, _round_up(B, _SUBLANE))
    return max(_SUBLANE, (bt // _SUBLANE) * _SUBLANE)


def image_model_forward(x_nhwc, prepped):
    """x_nhwc: (B, H, W, C) trunk feature map, channels-last (bf16 or f32).
    prepped: output of prepare_params."""
    B, H, W, C = x_nhwc.shape
    HW = H * W
    # Contiguous reshape only (no transpose, no extra HBM pass).
    x_r = x_nhwc.reshape(B, HW, C)

    w1t, b1 = prepped["w1t"], prepped["b1"]
    w2t, b2 = prepped["w2t"], prepped["b2"]
    w3t, b3 = prepped["w3t"], prepped["b3"]
    out_size = prepped["out_size"]
    out_pad = w3t.shape[1]

    itemsize = jnp.dtype(x_r.dtype).itemsize
    sublane_mult = _SUBLANE * max(1, 4 // itemsize)     # 8 (f32) / 16 (bf16)
    # Padding-aware per-batch-row footprint of the streamed block.
    padded_row_bytes = (_round_up(HW, sublane_mult) * _round_up(C, _LANE)
                        * itemsize)

    input_budget, vmem_limit = _vmem_budgets()
    bt = _pick_batch_tile(B, padded_row_bytes, input_budget)
    grid = (pl.cdiv(B, bt),)

    weight_bytes = 4 * (w1t.size + w2t.size + w3t.size + b1.size + b2.size + b3.size)
    cost = pl.CostEstimate(
        flops=B * HW * C + 2 * B * C * 32 + 2 * B * 32 * 16 + 2 * B * 16 * out_pad,
        transcendentals=0,
        bytes_accessed=x_r.size * itemsize + weight_bytes + B * out_pad * 4,
    )

    out = pl.pallas_call(
        image_model_kernel,
        out_shape=jax.ShapeDtypeStruct((B, out_pad), jnp.float32),
        grid_spec=pltpu.PrefetchScalarGridSpec(
            num_scalar_prefetch=0,
            grid=grid,
            in_specs=[
                pl.BlockSpec((bt, HW, C), lambda b: (b, 0, 0)),       # streamed
                pl.BlockSpec(w1t.shape, lambda b: (0, 0)),            # resident
                pl.BlockSpec(b1.shape, lambda b: (0, 0)),
                pl.BlockSpec(w2t.shape, lambda b: (0, 0)),
                pl.BlockSpec(b2.shape, lambda b: (0, 0)),
                pl.BlockSpec(w3t.shape, lambda b: (0, 0)),
                pl.BlockSpec(b3.shape, lambda b: (0, 0)),
            ],
            out_specs=pl.BlockSpec((bt, out_pad), lambda b: (b, 0)),
        ),
        compiler_params=pltpu.CompilerParams(
            dimension_semantics=("parallel",),
            vmem_limit_bytes=int(vmem_limit),
        ),
        cost_estimate=cost,
    )(x_r, w1t, b1, w2t, b2, w3t, b3)

    return out[:, :out_size]


def xavier_uniform(key, shape):
    # torch.nn.init.xavier_uniform_ on a (fan_out, fan_in) Linear weight.
    fan_out, fan_in = shape
    bound = (6.0 / (fan_in + fan_out)) ** 0.5
    return jax.random.uniform(key, shape, jnp.float32, minval=-bound, maxval=bound)


def init_params(key, num_ftrs, output_size):
    # structure = [('linear',[32,num_ftrs]), relu, ('linear',[16,32]), relu,
    #              ('linear',[output_size,16])]
    k1, k2, k3 = jax.random.split(key, 3)
    return {
        "w1": xavier_uniform(k1, (32, num_ftrs)),
        "b1": jnp.zeros((32,), jnp.float32),
        "w2": xavier_uniform(k2, (16, 32)),
        "b2": jnp.zeros((16,), jnp.float32),
        "w3": xavier_uniform(k3, (output_size, 16)),
        "b3": jnp.zeros((output_size,), jnp.float32),
    }


if __name__ == "__main__":
    key = jax.random.PRNGKey(0)
    kx, kp = jax.random.split(key)

    # Small, synthetic shapes: B=2, num_ftrs(C)=256 feature channels, 8x8 spatial.
    B, C, H, W = 2, 256, 8, 8
    output_size = 10

    # Trunk feature map (the ResNet50 trunk itself is not translated, see TODO).
    x_nchw = jax.random.normal(kx, (B, C, H, W), dtype=jnp.float32)
    # Trunk output presented channels-last and cast once to bf16 for streaming.
    x_nhwc = jnp.transpose(x_nchw, (0, 2, 3, 1)).astype(jnp.bfloat16)

    params = init_params(kp, num_ftrs=C, output_size=output_size)
    prepped = prepare_params(params, hw=H * W)   # one-time weight prep

    out = image_model_forward(x_nhwc, prepped)
    out = jax.block_until_ready(out)

    # Pure-JAX reference of the same math on the same (bf16-cast) features.
    xf = x_nhwc.astype(jnp.float32)
    feat = jnp.mean(xf, axis=(1, 2))                         # (B, C)
    ref = jnp.maximum(feat @ params["w1"].T + params["b1"], 0.0)
    ref = jnp.maximum(ref @ params["w2"].T + params["b2"], 0.0)
    ref = ref @ params["w3"].T + params["b3"]

    assert out.shape == (B, output_size)
    assert jnp.allclose(out, ref, atol=1e-3, rtol=1e-3), (
        float(jnp.max(jnp.abs(out - ref))))

    print("KERNEL_OK")
</pallas_src>

<mosaic_0001>
module attributes {stable_mosaic.version = 11 : i64} {
  func.func @image_model_kernel(%arg0: i32, %arg1: memref<2x64x256xbf16, #tpu.memory_space<vmem>>, %arg2: memref<256x32xf32, #tpu.memory_space<vmem>>, %arg3: memref<1x32xf32, #tpu.memory_space<vmem>>, %arg4: memref<32x16xf32, #tpu.memory_space<vmem>>, %arg5: memref<1x16xf32, #tpu.memory_space<vmem>>, %arg6: memref<16x128xf32, #tpu.memory_space<vmem>>, %arg7: memref<1x128xf32, #tpu.memory_space<vmem>>, %arg8: memref<2x128xf32, #tpu.memory_space<vmem>>) attributes {dimension_semantics = [#tpu.dimension_semantics<parallel>], iteration_bounds = array<i64: 1>, scalar_prefetch = 0 : i64, scratch_operands = 0 : i64, tpu.core_type = #tpu.core_type<tc>, window_params = [{transform_indices = @transform_0, window_bounds = array<i64: 2, 64, 256>}, {pipeline_mode = #tpu.pipeline_mode<synchronous>, transform_indices = @transform_1, window_bounds = array<i64: 256, 32>}, {pipeline_mode = #tpu.pipeline_mode<synchronous>, transform_indices = @transform_2, window_bounds = array<i64: 1, 32>}, {pipeline_mode = #tpu.pipeline_mode<synchronous>, transform_indices = @transform_3, window_bounds = array<i64: 32, 16>}, {pipeline_mode = #tpu.pipeline_mode<synchronous>, transform_indices = @transform_4, window_bounds = array<i64: 1, 16>}, {pipeline_mode = #tpu.pipeline_mode<synchronous>, transform_indices = @transform_5, window_bounds = array<i64: 16, 128>}, {pipeline_mode = #tpu.pipeline_mode<synchronous>, transform_indices = @transform_6, window_bounds = array<i64: 1, 128>}, {transform_indices = @transform_7, window_bounds = array<i64: 2, 128>}]} {
    %c0 = arith.constant 0 : index
    %c0_0 = arith.constant 0 : index
    %c0_1 = arith.constant 0 : index
    %0 = vector.load %arg1[%c0, %c0_0, %c0_1] : memref<2x64x256xbf16, #tpu.memory_space<vmem>>, vector<2x64x256xbf16>
    %1 = arith.extf %0 : vector<2x64x256xbf16> to vector<2x64x256xf32>
    %cst = arith.constant dense<0.000000e+00> : vector<2x256xf32>
    %2 = vector.multi_reduction <add>, %1, %cst [1] : vector<2x64x256xf32> to vector<2x256xf32>
    %c0_2 = arith.constant 0 : index
    %c0_3 = arith.constant 0 : index
    %3 = vector.load %arg2[%c0_2, %c0_3] : memref<256x32xf32, #tpu.memory_space<vmem>>, vector<256x32xf32>
    %cst_4 = arith.constant dense<0.000000e+00> : vector<2x32xf32>
    %4 = tpu.matmul %2, %3, %cst_4 {dimension_numbers = #tpu.dot_dimension_numbers<[1], [0], [0], [1], [0, 0, 1, 1], [], []>} : vector<2x256xf32>, vector<256x32xf32>, vector<2x32xf32> -> vector<2x32xf32>
    %c0_5 = arith.constant 0 : index
    %c0_6 = arith.constant 0 : index
    %5 = vector.load %arg3[%c0_5, %c0_6] : memref<1x32xf32, #tpu.memory_space<vmem>>, vector<1x32xf32>
    %6 = vector.broadcast %5 : vector<1x32xf32> to vector<2x32xf32>
    %7 = arith.addf %4, %6 : vector<2x32xf32>
    %cst_7 = arith.constant 0.000000e+00 : f32
    %8 = vector.broadcast %cst_7 : f32 to vector<2x32xf32>
    %9 = arith.maximumf %7, %8 : vector<2x32xf32>
    %c0_8 = arith.constant 0 : index
    %c0_9 = arith.constant 0 : index
    %10 = vector.load %arg4[%c0_8, %c0_9] : memref<32x16xf32, #tpu.memory_space<vmem>>, vector<32x16xf32>
    %cst_10 = arith.constant dense<0.000000e+00> : vector<2x16xf32>
    %11 = tpu.matmul %9, %10, %cst_10 {dimension_numbers = #tpu.dot_dimension_numbers<[1], [0], [0], [1], [0, 0, 1, 1], [], []>} : vector<2x32xf32>, vector<32x16xf32>, vector<2x16xf32> -> vector<2x16xf32>
    %c0_11 = arith.constant 0 : index
    %c0_12 = arith.constant 0 : index
    %12 = vector.load %arg5[%c0_11, %c0_12] : memref<1x16xf32, #tpu.memory_space<vmem>>, vector<1x16xf32>
    %13 = vector.broadcast %12 : vector<1x16xf32> to vector<2x16xf32>
    %14 = arith.addf %11, %13 : vector<2x16xf32>
    %cst_13 = arith.constant 0.000000e+00 : f32
    %15 = vector.broadcast %cst_13 : f32 to vector<2x16xf32>
    %16 = arith.maximumf %14, %15 : vector<2x16xf32>
    %c0_14 = arith.constant 0 : index
    %c0_15 = arith.constant 0 : index
    %17 = vector.load %arg6[%c0_14, %c0_15] : memref<16x128xf32, #tpu.memory_space<vmem>>, vector<16x128xf32>
    %cst_16 = arith.constant dense<0.000000e+00> : vector<2x128xf32>
    %18 = tpu.matmul %16, %17, %cst_16 {dimension_numbers = #tpu.dot_dimension_numbers<[1], [0], [0], [1], [0, 0, 1, 1], [], []>} : vector<2x16xf32>, vector<16x128xf32>, vector<2x128xf32> -> vector<2x128xf32>
    %c0_17 = arith.constant 0 : index
    %c0_18 = arith.constant 0 : index
    %19 = vector.load %arg7[%c0_17, %c0_18] : memref<1x128xf32, #tpu.memory_space<vmem>>, vector<1x128xf32>
    %20 = vector.broadcast %19 : vector<1x128xf32> to vector<2x128xf32>
    %21 = arith.addf %18, %20 : vector<2x128xf32>
    %c0_19 = arith.constant 0 : index
    %c0_20 = arith.constant 0 : index
    %22 = vector.load %arg8[%c0_19, %c0_20] : memref<2x128xf32, #tpu.memory_space<vmem>>, vector<2x128xf32>
    tpu.vector_store %arg8[%c0_19, %c0_20], %21 {strides = array<i32>} : memref<2x128xf32, #tpu.memory_space<vmem>>, vector<2x128xf32>,
    return
  }
  func.func @transform_0(%arg0: i32) -> (i32, i32, i32) {
    %c0_i32 = arith.constant 0 : i32
    %c0_i32_0 = arith.constant 0 : i32
    %c0_i32_1 = arith.constant 0 : i32
    return %arg0, %c0_i32, %c0_i32_0 : i32, i32, i32
  }
  func.func @transform_1(%arg0: i32) -> (i32, i32) {
    %c0_i32 = arith.constant 0 : i32
    %c0_i32_0 = arith.constant 0 : i32
    %c0_i32_1 = arith.constant 0 : i32
    return %c0_i32, %c0_i32_0 : i32, i32
  }
  func.func @transform_2(%arg0: i32) -> (i32, i32) {
    %c0_i32 = arith.constant 0 : i32
    %c0_i32_0 = arith.constant 0 : i32
    %c0_i32_1 = arith.constant 0 : i32
    return %c0_i32, %c0_i32_0 : i32, i32
  }
  func.func @transform_3(%arg0: i32) -> (i32, i32) {
    %c0_i32 = arith.constant 0 : i32
    %c0_i32_0 = arith.constant 0 : i32
    %c0_i32_1 = arith.constant 0 : i32
    return %c0_i32, %c0_i32_0 : i32, i32
  }
  func.func @transform_4(%arg0: i32) -> (i32, i32) {
    %c0_i32 = arith.constant 0 : i32
    %c0_i32_0 = arith.constant 0 : i32
    %c0_i32_1 = arith.constant 0 : i32
    return %c0_i32, %c0_i32_0 : i32, i32
  }
  func.func @transform_5(%arg0: i32) -> (i32, i32) {
    %c0_i32 = arith.constant 0 : i32
    %c0_i32_0 = arith.constant 0 : i32
    %c0_i32_1 = arith.constant 0 : i32
    return %c0_i32, %c0_i32_0 : i32, i32
  }
  func.func @transform_6(%arg0: i32) -> (i32, i32) {
    %c0_i32 = arith.constant 0 : i32
    %c0_i32_0 = arith.constant 0 : i32
    %c0_i32_1 = arith.constant 0 : i32
    return %c0_i32, %c0_i32_0 : i32, i32
  }
  func.func @transform_7(%arg0: i32) -> (i32, i32) {
    %c0_i32 = arith.constant 0 : i32
    %c0_i32_0 = arith.constant 0 : i32
    return %arg0, %c0_i32 : i32, i32
  }
}

</mosaic_0001>

<bundles_post_ra>
// kernel: tpu_custom_call.1
= control target key start
LH: loop header
LB: loop body
LE: loop exit
PB: predicated region body
PF: predicated region fallthrough
CT: control target
= control target key end

     0   :  { %s846_s0 = inlined_call_operand.vmem [shape: bf16[2,64,256], index: 0, kind: input, shape index: {}]   ;;  %s847_s1 = inlined_call_operand.vmem [shape: f32[256,32], index: 1, kind: input, shape index: {}]   ;;  %s848_s2 = inlined_call_operand.vmem [shape: f32[1,32], index: 2, kind: input, shape index: {}]   ;;  %s849_s3 = inlined_call_operand.vmem [shape: f32[32,16], index: 3, kind: input, shape index: {}]   ;;  %s850_s4 = inlined_call_operand.vmem [shape: f32[1,16], index: 4, kind: input, shape index: {}]   ;;  %s851_s5 = inlined_call_operand.vmem [shape: f32[16,128], index: 5, kind: input, shape index: {}]   ;;  %s852_s6 = inlined_call_operand.vmem [shape: f32[1,128], index: 6, kind: input, shape index: {}]   ;;  %s853_s7 = inlined_call_operand.hbm [shape: f32[2,128], index: 7, kind: output, shape index: {}]  }
   0x1   :  { %v143_v0 = vld [vmem:[%s847_s1 + $0x80] sm:$0xff]  ;;  %v144_v1 = vld [vmem:[%s847_s1 + $0x88] sm:$0xff]  ;;  %v145_v5 = vld [vmem:[%s847_s1 + $0x90] sm:$0xff] }
   0x2   :  { %v127_v2 = vld [vmem:[%s847_s1] sm:$0xff]  ;;  %v496_v3 = vpack.c.bf16 %v144_v1, %v143_v0  ;;  %v128_v4 = vld [vmem:[%s847_s1 + $0x8] sm:$0xff]  ;;  %v146_v6 = vld [vmem:[%s847_s1 + $0x98] sm:$0xff] }
   0x3   :  { %v498_v7 = vpack.c.bf16 %v128_v4, %v127_v2  ;;  %v500_v8 = vpack.c.bf16 %v146_v6, %v145_v5  ;;  %v129_v9 = vld [vmem:[%s847_s1 + $0x10] sm:$0xff]  ;;  %v130_v10 = vld [vmem:[%s847_s1 + $0x18] sm:$0xff]  ;;  %v147_v11 = vld [vmem:[%s847_s1 + $0xa0] sm:$0xff] }
   0x4   :  { %497 = vmatprep.subr.bf16.mxu0 %v496_v3  ;;  %v148_v12 = vld [vmem:[%s847_s1 + $0xa8] sm:$0xff]  ;;  %v502_v13 = vpack.c.bf16 %v130_v10, %v129_v9  ;;  %v131_v15 = vld [vmem:[%s847_s1 + $0x20] sm:$0xff]  ;;  %v149_v17 = vld [vmem:[%s847_s1 + $0xb0] sm:$0xff] }
   0x5   :  { %499 = vmatpush3.bf16.msra.mxu0 %v498_v7  ;;  %v504_v14 = vpack.c.bf16 %v148_v12, %v147_v11  ;;  %v132_v16 = vld [vmem:[%s847_s1 + $0x28] sm:$0xff]  ;;  %v150_v18 = vld [vmem:[%s847_s1 + $0xb8] sm:$0xff]  ;;  %v133_v20 = vld [vmem:[%s847_s1 + $0x30] sm:$0xff] }
   0x6   :  { %501 = vmatprep.subr.bf16.mxu0 %v500_v8  ;;  %v506_v19 = vpack.c.bf16 %v132_v16, %v131_v15  ;;  %v508_v21 = vpack.c.bf16 %v150_v18, %v149_v17  ;;  %v134_v22 = vld [vmem:[%s847_s1 + $0x38] sm:$0xff]  ;;  %v151_v23 = vld [vmem:[%s847_s1 + $0xc0] sm:$0xff]  ;;  %v152_v24 = vld [vmem:[%s847_s1 + $0xc8] sm:$0xff] }
   0x7   :  { %v135_v25 = vld [vmem:[%s847_s1 + $0x40] sm:$0xff]  ;;  %v136_v26 = vld [vmem:[%s847_s1 + $0x48] sm:$0xff]  ;;  %v153_v27 = vld [vmem:[%s847_s1 + $0xd0] sm:$0xff]  ;;  %v510_v37 = vpack.c.bf16 %v134_v22, %v133_v20  ;;  %v512_v43 = vpack.c.bf16 %v152_v24, %v151_v23 }
   0x8   :  { %v154_v28 = vld [vmem:[%s847_s1 + $0xd8] sm:$0xff]  ;;  %v678_v29 = vld [vmem:[%s847_s1 + $0x50] sm:$0xff]  ;;  %v688_v31 = vld [vmem:[%s846_s0] sm:$0xff]  ;;  %v514_v53 = vpack.c.bf16 %v136_v26, %v135_v25 }
   0x9   :  { %503 = vmatpush3.bf16.msra.mxu0 %v502_v13  ;;  %v683_v30 = vld [vmem:[%s847_s1 + $0x58] sm:$0xff]  ;;  %v693_v32 = vld [vmem:[%s847_s1 + $0xe0] sm:$0xff]  ;;  %v698_v33 = vld [vmem:[%s846_s0 + $0x8] sm:$0xff]  ;;  %v44_v36 = vunpack.c.h.bf16 %v688_v31  ;;  %v516_v54 = vpack.c.bf16 %v154_v28, %v153_v27 }
   0xa   :  { %505 = vmatprep.subr.bf16.mxu0 %v504_v14  ;;  %v703_v34 = vld [vmem:[%s846_s0 + $0x10] sm:$0xff]  ;;  %v708_v35 = vld [vmem:[%s846_s0 + $0x18] sm:$0xff]  ;;  %v714_v38 = vld [vmem:[%s847_s1 + $0xe8] sm:$0xff]  ;;  %v46_v41 = vunpack.c.h.bf16 %v698_v33  ;;  %v518_v55 = vpack.c.bf16 %v683_v30, %v678_v29 }
   0xb   :  { %v719_v39 = vld [vmem:[%s847_s1 + $0x60] sm:$0xff]  ;;  %v724_v40 = vld [vmem:[%s847_s1 + $0x68] sm:$0xff]  ;;  %v48_v42 = vunpack.c.h.bf16 %v703_v34  ;;  %v37_v47 = vld [vmem:[%s846_s0 + $0x50] sm:$0xff]  ;;  %v50_v49 = vunpack.c.h.bf16 %v708_v35  ;;  %v520_v58 = vpack.c.bf16 %v714_v38, %v693_v32 }
   0xc   :  { %v731_v44 = vld [vmem:[%s846_s0 + $0x20] sm:$0xff]  ;;  %v36_v46 = vld [vmem:[%s846_s0 + $0x48] sm:$0xff]  ;;  %v745_v48 = vld [vmem:[%s846_s0 + $0x58] sm:$0xff]  ;;  %v88_v52 = vadd.f32 %v46_v41, %v44_v36  ;;  %v64_v57 = vunpack.c.h.bf16 %v37_v47  ;;  %v522_v59 = vpack.c.bf16 %v724_v40, %v719_v39 }
   0xd   :  { %507 = vmatpush3.bf16.msra.mxu0 %v506_v19  ;;  %v35_v45 = vld [vmem:[%s846_s0 + $0x40] sm:$0xff]  ;;  %v62_v51 = vunpack.c.h.bf16 %v36_v46  ;;  %v753_v56 = vld [vmem:[%s846_s0 + $0x28] sm:$0xff]  ;;  %v52_v61 = vunpack.c.h.bf16 %v731_v44 }
   0xe   :  { %509 = vmatprep.subr.bf16.mxu0 %v508_v21  ;;  %v60_v50 = vunpack.c.h.bf16 %v35_v45  ;;  %v39_v60 = vld [vmem:[%s846_s0 + $0x60] sm:$0xff]  ;;  %v89_v62 = vadd.f32 %v88_v52, %v48_v42 }
  0x11   :  { %511 = vmatpush3.bf16.msra.mxu0 %v510_v37 }
  0x12   :  { %12 = vsyncpa [#allocation3], 0  ;;  %513 = vmatprep.subr.bf16.mxu0 %v512_v43  ;;  %v766_v63 = vld [vmem:[%s846_s0 + $0x30] sm:$0xff]  ;;  %v771_v0 = vld [vmem:[%s846_s0 + $0x68] sm:$0xff]  ;;  %v66_v1 = vunpack.c.h.bf16 %v745_v48  ;;  %v114_v2 = vadd.f32 %v62_v51, %v60_v50  ;;  %v43_v3 = vunpack.c.l.bf16 %v688_v31  ;;  %v45_v4 = vunpack.c.l.bf16 %v698_v33  ;;  %s568_s19 = smov [#allocation2]  }
  0x13   :  { %v54_v5 = vunpack.c.h.bf16 %v753_v56  ;;  %v90_v6 = vadd.f32 %v89_v62, %v50_v49  ;;  %v59_v7 = vunpack.c.l.bf16 %v35_v45  ;;  %v61_v8 = vunpack.c.l.bf16 %v36_v46  ;;  %v34_v9 = vld [vmem:[%s846_s0 + $0x38] sm:$0xff]  ;;  %v41_v10 = vld [vmem:[%s846_s0 + $0x70] sm:$0xff]  ;;  %s422_s20 = sshll.u32 %s568_s19, 4  ;;  %s423_s20 = int_to_ptr.vmem [resolvable:$true] %s422_s20 }
  0x14   :  { %v68_v11 = vunpack.c.h.bf16 %v39_v60  ;;  %v115_v12 = vadd.f32 %v114_v2, %v64_v57  ;;  %v47_v13 = vunpack.c.l.bf16 %v703_v34  ;;  %v63_v14 = vunpack.c.l.bf16 %v37_v47  ;;  %v157_v19 = vld [vmem:[%s847_s1 + $0xf0] sm:$0xff]  ;;  %v158_v20 = vld [vmem:[%s847_s1 + $0xf8] sm:$0xff]  ;;  %p546_p1 = scmp.lt.s32.totalorder %s423_s20, %s423_s20 }
  0x15   :  { %515 = vmatpush3.bf16.msra.mxu0 %v514_v53  ;;  %v56_v15 = vunpack.c.h.bf16 %v766_v63  ;;  %v70_v16 = vunpack.c.h.bf16 %v771_v0  ;;  %v91_v17 = vadd.f32 %v90_v6, %v52_v61  ;;  %v49_v18 = vunpack.c.l.bf16 %v708_v35  ;;  %v42_v21 = vld [vmem:[%s846_s0 + $0x78] sm:$0xff]  ;;  %v141_v38 = vld [vmem:[%s847_s1 + $0x70] sm:$0xff] }
  0x16   :  { %517 = vmatprep.subr.bf16.mxu0 %v516_v54  ;;  %v116_v22 = vadd.f32 %v115_v12, %v66_v1  ;;  %v65_v23 = vunpack.c.l.bf16 %v745_v48  ;;  %v75_v24 = vadd.f32 %v45_v4, %v43_v3  ;;  %v101_v25 = vadd.f32 %v61_v8, %v59_v7  ;;  %v142_v39 = vld [vmem:[%s847_s1 + $0x78] sm:$0xff] }
  0x17   :  { %v58_v26 = vunpack.c.h.bf16 %v34_v9  ;;  %v72_v27 = vunpack.c.h.bf16 %v41_v10  ;;  %v92_v28 = vadd.f32 %v91_v17, %v54_v5  ;;  %v51_v29 = vunpack.c.l.bf16 %v731_v44 }
  0x18   :  { %v117_v30 = vadd.f32 %v116_v22, %v68_v11  ;;  %v67_v31 = vunpack.c.l.bf16 %v39_v60  ;;  %v76_v32 = vadd.f32 %v75_v24, %v47_v13  ;;  %v102_v33 = vadd.f32 %v101_v25, %v63_v14  ;;  %v246_v22 = vld [vmem:[%s849_s3] sm:$0xff] }
  0x19   :  { %519 = vmatpush3.bf16.msra.mxu0 %v518_v55  ;;  %v524_v34 = vpack.c.bf16 %v158_v20, %v157_v19  ;;  %v74_v35 = vunpack.c.h.bf16 %v42_v21  ;;  %v93_v36 = vadd.f32 %v92_v28, %v56_v15  ;;  %v53_v37 = vunpack.c.l.bf16 %v753_v56 }
  0x1a   :  { %521 = vmatprep.subr.bf16.mxu0 %v520_v58  ;;  %v118_v40 = vadd.f32 %v117_v30, %v70_v16  ;;  %v69_v41 = vunpack.c.l.bf16 %v771_v0  ;;  %v77_v42 = vadd.f32 %v76_v32, %v49_v18  ;;  %v103_v43 = vadd.f32 %v102_v33, %v65_v23  ;;  %v247_v23 = vld [vmem:[%s849_s3 + $0x8] sm:$0xff] }
  0x1b   :  { %v94_v44 = vadd.f32 %v93_v36, %v58_v26  ;;  %v55_v45 = vunpack.c.l.bf16 %v766_v63  ;;  %v71_v47 = vunpack.c.l.bf16 %v41_v10  ;;  %v526_v50 = vpack.c.bf16 %v142_v39, %v141_v38  ;;  %v248_v26 = vld [vmem:[%s849_s3 + $0x10] sm:$0xff]  ;;  %v332_v36 = vld [vmem:[%s851_s5] sm:$0xff] }
  0x1c   :  { %v119_v46 = vadd.f32 %v118_v40, %v72_v27  ;;  %v78_v48 = vadd.f32 %v77_v42, %v51_v29  ;;  %v104_v49 = vadd.f32 %v103_v43, %v67_v31  ;;  %v57_v52 = vunpack.c.l.bf16 %v34_v9  ;;  %v249_v27 = vld [vmem:[%s849_s3 + $0x18] sm:$0xff]  ;;  %v430_v31 = vld [vmem:[%s848_s2] ss:$0 sm:$0xff] }
  0x1d   :  { %523 = vmatpush3.bf16.msra.mxu0 %v522_v59  ;;  %v95_v51 = vrot.slane %v94_v44, 4  ;;  %v73_v54 = vunpack.c.l.bf16 %v42_v21  ;;  %vm170_vm0 = vcmask 1041409   ;;  %v529_v24 = vpack.c.bf16 %v247_v23, %v246_v22  ;;  %v431_v39 = vld [vmem:[%s850_s4] ss:$0 sm:$0xff] }
  0x1e   :  { %525 = vmatprep.subr.bf16.mxu0 %v524_v34  ;;  %v120_v53 = vadd.f32 %v119_v46, %v74_v35  ;;  %v79_v55 = vadd.f32 %v78_v48, %v53_v37  ;;  %v105_v56 = vadd.f32 %v104_v49, %v69_v41  ;;  %v565_v25 = vmov 0.0|0.0   ;;  %v333_v37 = vld [vmem:[%s851_s5 + $0x8] sm:$0xff]  ;;  %s541_s5 = scalar_lea.vmem %s423_s20, 32 }
  0x1f   :  { %v96_v57 = vadd.f32 %v95_v51, %v94_v44  ;;  %528 = vmatprep.subr.bf16.mxu1 %v565_v25  ;;  %v532_v28 = vpack.c.bf16 %v249_v27, %v248_v26  ;;  %vm566_vm1 = vmmov 0   ;;  %v567_v29 = vmov 0.0   ;;  %v433_v44 = vld [vmem:[%s852_s6] ss:$0 sm:$0xff]  ;;  %p542_p0 = scmp.ne.s32.totalorder %s423_s20, %s541_s5  ;;  %p547_p2 = scmp.lt.s32.totalorder %s541_s5, %s541_s5 }
  0x20   :  { %v121_v58 = vrot.slane %v120_v53, 4  ;;  %v80_v60 = vadd.f32 %v79_v55, %v55_v45  ;;  %v106_v61 = vadd.f32 %v105_v56, %v71_v47  ;;  %530 = vmatpush3.bf16.msra.mxu1 %v529_v24  ;;  %486 = vmatprep.mubr.msk.f32.mxu1 %vm566_vm1, %v567_v29  ;;  %vm257_vm2 = vcmask 261120  }
  0x21   :  { %527 = vmatpush3.bf16.msra.mxu0 %v526_v50  ;;  %v97_v62 = vrot.slane %v96_v57, 2  ;;  %531 = vmatprep.subr.bf16.mxu1 %v565_v25  ;;  %v535_v38 = vpack.c.bf16 %v333_v37, %v332_v36  ;;  %vm341_vm3 = vcmask 130048   ;;  %p548_p3 = por %p547_p2, %p546_p1 }
  0x22   :  { %v122_v63 = vadd.f32 %v121_v58, %v120_v53  ;;  %v81_v0 = vadd.f32 %v80_v60, %v57_v52  ;;  %v107_v1 = vadd.f32 %v106_v61, %v73_v54 }
  0x23   :  { %v98_v2 = vadd.f32 %v97_v62, %v96_v57  ;;  %p549_p4 = pnand %p548_p3, %p542_p0 }
  0x24   :  { %v123_v3 = vrot.slane %v122_v63, 2  ;;  %v82_v59 = vrot.slane %v81_v0, 4  ;;  %v108_v4 = vrot.slane %v107_v1, 4  ;;  %533 = vmatpush3.bf16.msra.mxu1 %v532_v28 }
  0x25   :  { %v99_v5 = vrot.slane %v98_v2, 1  ;;  %534 = vmatprep.subr.bf16.mxu1 %v565_v25 }
  0x26   :  { %v124_v6 = vadd.f32 %v123_v3, %v122_v63  ;;  %v83_v7 = vadd.f32 %v82_v59, %v81_v0  ;;  %v109_v8 = vadd.f32 %v108_v4, %v107_v1 }
  0x27   :  { %v100_v9 = vadd.f32 %v99_v5, %v98_v2 }
  0x28   :  { %v125_v10 = vrot.slane %v124_v6, 1  ;;  %v84_v11 = vrot.slane %v83_v7, 2  ;;  %v110_v12 = vrot.slane %v109_v8, 2 }
  0x2a   :  { %v126_v13 = vadd.f32 %v125_v10, %v124_v6  ;;  %v85_v14 = vadd.f32 %v84_v11, %v83_v7  ;;  %v111_v15 = vadd.f32 %v110_v12, %v109_v8 }
  0x2c   :  { %v172_v16 = vsel %vm170_vm0, %v126_v13, %v100_v9  ;;  %v86_v17 = vrot.slane %v85_v14, 1  ;;  %v112_v18 = vrot.slane %v111_v15, 1 }
  0x2d   :  { %239 = vmatprep.mubr.f32.mxu0 %v172_v16 }
  0x2e   :  { %v87_v19 = vadd.f32 %v86_v17, %v85_v14  ;;  %v113_v20 = vadd.f32 %v112_v18, %v111_v15 }
  0x30   :  { %v171_v21 = vsel %vm170_vm0, %v113_v20, %v87_v19 }
  0x31   :  { %240 = vmatmul.mubr.f32.vlgmr.msra.gmra.mrb[0].mxu0 %v171_v21 }
 0x104   :  { %v467_v30 = vpop.f32.mrb[0].mxu0 }
 0x105   :  { %v468_v32 = vpop.f32.mrb[1].mxu0 }
 0x106   :  { %v469_v33 = vadd.f32 %v468_v32, %v467_v30 }
 0x108   :  { %v242_v34 = vadd.f32 %v469_v33, %v430_v31 }
 0x10a   :  { %v245_v35 = vmax.f32 %v242_v34, 0.0 }
 0x10c   :  { %487 = vmatmul.mubr.msk.f32.vlgmr.msra.gmra.mrb[0].mxu1 %vm257_vm2, %v245_v35 }
 0x10d   :  { %493 = vmatprep.mubr.msk.f32.mxu1 %vm566_vm1, %v567_v29  ;;  %536 = vmatpush3.bf16.msra.mxu1 %v535_v38 }
 0x1df   :  { %v327_v40 = vpop.f32.mrb[0].mxu1 }
 0x1e0   :  { %v328_v41 = vadd.f32 %v431_v39, %v327_v40  ;;  %v488_v42 = vpop.f32.mrb[1].mxu1 }
 0x1e2   :  { %v331_v43 = vmax.f32 %v328_v41, 0.0 }
 0x1e4   :  { %494 = vmatmul.mubr.msk.f32.vlgmr.msra.gmra.mrb[2].mxu1 %vm341_vm3, %v331_v43 }
 0x2b7   :  { %v411_v45 = vpop.f32.mrb[2].mxu1 }
 0x2b8   :  { %v412_v46 = vadd.f32 %v433_v44, %v411_v45  ;;  %v495_v47 = vpop.f32.mrb[3].mxu1 }
 0x2ba   :  { %415 = vst [vmem:[#allocation2] sm:$0x3] %v412_v46 }
 0x2bb   :  { %552 = shalt.err (!%p549_p4)
}
 0x2bc   :  { %s553_s22 = scalar_lea.hbm %s853_s7, 32 }
 0x2bd   :  { %p554_p5 = scmp.ne.s32.totalorder %s853_s7, %s553_s22  ;;  %p557_p6 = scmp.lt.u32.totalorder %s553_s22, %s853_s7 }
 0x2bf   :  { %p559_p7 = pnand %p557_p6, %p554_p5 }
 0x2c1   :  { %562 = shalt.err (!%p559_p7)
}
 0x2c2   :  { %425 = dma.vmem_to_hbm [thread:$0]  %s423_s20, 32, %s853_s7, [#allocation3]  }
 0x2c3   :  { %563 = dma.done.wait [#allocation3], 32  }
 0x2c4   :  { %564 = vsyncadd [#allocation3], 4294967264 }
 0x2c5   :  { %429 = vsyncpa [#allocation3], 1 }

</bundles_post_ra>
